<compile_context>
chip_gen: v5e
topology: v5e:2x2
jax: 0.10.0
libtpu: 0.0.40
codegen_flags: <defaults>
</compile_context>

<pallas_src>
import jax
import jax.numpy as jnp
from jax.experimental import pallas as pl
from jax.experimental.pallas import tpu as pltpu

SCALE = 32.0  # module hardcodes self.scale = 32 (ignores hidden_size)

_ENC_BUFFER_TARGET_BYTES = 6 << 20   # ~6 MiB per encoder tile (double-buffered by Pallas)
_VMEM_LIMIT_FLOOR_BYTES = 32 << 20   # raise v5e's 16 MiB scoped default
_VMEM_LIMIT_CAP_BYTES = 48 << 20     # stay well under v7x's 64 MiB physical VMEM per TC


def _attn_kernel(hidden_ref, enc_ref, out_ref):
    # hidden_ref: (TB, 1, H), enc_ref: (TB, S, H), out_ref: (TB, 1, S)
    inv_scale = 1.0 / SCALE                   # power of two: folding is lossless
    h = hidden_ref[...] * inv_scale           # stays in input dtype
    # scores[b, 0, s] = sum_h h[b, 0, h] * enc[b, s, h]  -- MXU, f32 accumulation.
    scores = jnp.einsum("bqh,bsh->bqs", h, enc_ref[...],
                        preferred_element_type=jnp.float32)    # (TB, 1, S) f32
    m = jnp.max(scores, axis=-1, keepdims=True)
    p = jnp.exp(scores - m)
    denom = jnp.sum(p, axis=-1, keepdims=True)
    out_ref[...] = (p * pl.reciprocal(denom, approx=True)).astype(out_ref.dtype)


def _attn_kernel_s_tiled(hidden_ref, enc_ref, out_ref, scores_ref):
    # hidden_ref: (TB, 1, H), enc_ref: (TB, TS, H), out_ref: (TB, 1, S)
    # scores_ref: (TB, 1, S) f32 VMEM scratch, resident across the S grid axis.
    s = pl.program_id(1)
    ts = enc_ref.shape[1]
    inv_scale = 1.0 / SCALE
    h = hidden_ref[...] * inv_scale
    tile = jnp.einsum("bqh,bsh->bqs", h, enc_ref[...],
                      preferred_element_type=jnp.float32)      # (TB, 1, TS) f32
    off = pl.multiple_of(s * ts, ts)
    scores_ref[:, :, pl.ds(off, ts)] = tile

    @pl.when(s == pl.num_programs(1) - 1)
    def _():
        sc = scores_ref[...]
        m = jnp.max(sc, axis=-1, keepdims=True)
        p = jnp.exp(sc - m)
        denom = jnp.sum(p, axis=-1, keepdims=True)
        out_ref[...] = (p * pl.reciprocal(denom, approx=True)).astype(out_ref.dtype)


def _choose_blocks(B, S, H, enc_itemsize):
    """Pick (block_b, block_s) so the encoder tile lands in the multi-MiB range."""
    per_batch = S * H * enc_itemsize
    divisors = [d for d in range(1, B + 1) if B % d == 0]
    fitting = [d for d in divisors if d * per_batch <= _ENC_BUFFER_TARGET_BYTES]
    if fitting:
        # Prefer a grid of >= 2 batch steps so the "parallel" axis can use both
        # TensorCores on v7x; otherwise take the largest block that fits the budget.
        sub = [d for d in fitting if d <= B // 2] or fitting
        return max(sub), S
    # A single batch row's slab already exceeds the target: tile the sequence axis.
    block_s = S
    for align in (128, 8):   # lane-aligned tiles first, sublane-aligned fallback
        if S % align == 0:
            n = S // align
            best = align
            for d in range(1, n + 1):
                if n % d == 0 and d * align * H * enc_itemsize <= _ENC_BUFFER_TARGET_BYTES:
                    best = max(best, d * align)
            block_s = best
            break
    return 1, block_s


def attention(hidden, encoder_outputs, *, block_b=None, block_s=None):
    """hidden: (B, H), encoder_outputs: (B, S, H) -> attn_weights: (B, S)."""
    B, H = hidden.shape
    Bs, S, He = encoder_outputs.shape
    assert B == Bs and H == He
    out_dtype = jnp.result_type(hidden.dtype, encoder_outputs.dtype)

    enc_item = jnp.dtype(encoder_outputs.dtype).itemsize
    hid_item = jnp.dtype(hidden.dtype).itemsize
    out_item = jnp.dtype(out_dtype).itemsize

    auto_b, auto_s = _choose_blocks(B, S, H, enc_item)
    block_b = auto_b if block_b is None else block_b
    block_s = auto_s if block_s is None else block_s
    assert B % block_b == 0, "block_b must divide B"
    assert S % block_s == 0 and (block_s % 8 == 0 or block_s == S), \
        "block_s must divide S and be 8-aligned (or equal S)"

    s_tiled = block_s < S
    nb, ns = B // block_b, S // block_s

    cost = pl.CostEstimate(
        flops=2 * B * S * H,
        transcendentals=B * S,  # exp in the softmax
        bytes_accessed=(B * S * H * enc_item + B * H * hid_item + B * S * out_item),
    )

    # VMEM budget: double-buffered encoder/hidden/out blocks, f32 softmax intermediates,
    # scores scratch on the S-tiled path.  Sublane padding (x8) counted for the skinny
    # unit-dim slabs; headroom added; clamped to [32 MiB, 48 MiB].
    needed = (2 * block_b * block_s * H * enc_item
              + 2 * block_b * 8 * H * hid_item
              + 2 * block_b * 8 * S * out_item
              + (block_b * 8 * S * 4 if s_tiled else 0)
              + 4 * block_b * 8 * S * 4)
    vmem_limit = min(max(int(needed * 1.3) + (2 << 20), _VMEM_LIMIT_FLOOR_BYTES),
                     _VMEM_LIMIT_CAP_BYTES)

    hidden3 = hidden.reshape(B, 1, H)   # unit-dim reshape: free on the host side

    if not s_tiled:
        grid_spec = pltpu.PrefetchScalarGridSpec(
            num_scalar_prefetch=0,
            grid=(nb,),
            in_specs=[
                pl.BlockSpec((block_b, 1, H), lambda b: (b, 0, 0)),
                pl.BlockSpec((block_b, S, H), lambda b: (b, 0, 0)),
            ],
            out_specs=pl.BlockSpec((block_b, 1, S), lambda b: (b, 0, 0)),
        )
        kernel = _attn_kernel
        dims = ("parallel",)
    else:
        grid_spec = pltpu.PrefetchScalarGridSpec(
            num_scalar_prefetch=0,
            grid=(nb, ns),
            in_specs=[
                pl.BlockSpec((block_b, 1, H), lambda b, s: (b, 0, 0)),
                pl.BlockSpec((block_b, block_s, H), lambda b, s: (b, s, 0)),
            ],
            out_specs=pl.BlockSpec((block_b, 1, S), lambda b, s: (b, 0, 0)),
            scratch_shapes=[pltpu.VMEM((block_b, 1, S), jnp.float32)],
        )
        kernel = _attn_kernel_s_tiled
        dims = ("parallel", "arbitrary")

    out3 = pl.pallas_call(
        kernel,
        out_shape=jax.ShapeDtypeStruct((B, 1, S), out_dtype),
        grid_spec=grid_spec,
        compiler_params=pltpu.CompilerParams(
            dimension_semantics=dims,
            vmem_limit_bytes=vmem_limit,
        ),
        cost_estimate=cost,
    )(hidden3, encoder_outputs)

    return out3.reshape(B, S)


def attention_ref(hidden, encoder_outputs):
    out_dtype = jnp.result_type(hidden.dtype, encoder_outputs.dtype)
    scores = jnp.einsum("bh,bsh->bs", hidden, encoder_outputs,
                        preferred_element_type=jnp.float32) / SCALE
    return jax.nn.softmax(scores, axis=1).astype(out_dtype)


if __name__ == "__main__":
    key = jax.random.PRNGKey(0)
    ks = jax.random.split(key, 8)

    # Case 1: module-implied small shapes (B=2, S=8, H=32) -> simple path, grid (2,).
    B, S, H = 2, 8, 32
    hidden = jax.random.normal(ks[0], (B, H), dtype=jnp.float32)
    enc = jax.random.normal(ks[1], (B, S, H), dtype=jnp.float32)
    out = jax.block_until_ready(attention(hidden, enc))
    ref = attention_ref(hidden, enc)
    assert out.shape == (B, S)
    assert jnp.allclose(out, ref, atol=5e-4, rtol=2e-3), "mismatch vs reference (case 1)"

    # Case 2: batch-tiled path (block_b=8, grid of 2) with tile-aligned shapes.
    B2, S2, H2 = 16, 128, 64
    hidden2 = jax.random.normal(ks[2], (B2, H2), dtype=jnp.float32)
    enc2 = jax.random.normal(ks[3], (B2, S2, H2), dtype=jnp.float32)
    out2 = jax.block_until_ready(attention(hidden2, enc2))
    ref2 = attention_ref(hidden2, enc2)
    assert out2.shape == (B2, S2)
    assert jnp.allclose(out2, ref2, atol=5e-4, rtol=2e-3), "mismatch vs reference (case 2)"

    # Case 3: S-tiled path forced at small shapes (scratch + pl.when finalize), grid (2, 2).
    B3, S3, H3 = 2, 256, 128
    hidden3 = jax.random.normal(ks[4], (B3, H3), dtype=jnp.float32)
    enc3 = jax.random.normal(ks[5], (B3, S3, H3), dtype=jnp.float32)
    out3 = jax.block_until_ready(attention(hidden3, enc3, block_s=128))
    ref3 = attention_ref(hidden3, enc3)
    assert out3.shape == (B3, S3)
    assert jnp.allclose(out3, ref3, atol=5e-4, rtol=2e-3), "mismatch vs reference (case 3)"

    # Case 4: bf16 encoder inputs (halves HBM traffic on this memory-bound kernel).
    B4, S4, H4 = 4, 128, 64
    hidden4 = jax.random.normal(ks[6], (B4, H4), dtype=jnp.bfloat16)
    enc4 = jax.random.normal(ks[7], (B4, S4, H4), dtype=jnp.bfloat16)
    out4 = jax.block_until_ready(attention(hidden4, enc4))
    ref4 = attention_ref(hidden4, enc4)
    assert out4.shape == (B4, S4)
    assert jnp.allclose(out4.astype(jnp.float32), ref4.astype(jnp.float32),
                        atol=2e-2, rtol=2e-2), "mismatch vs reference (case 4)"

    print("KERNEL_OK")
</pallas_src>

<mosaic_0001>
module attributes {stable_mosaic.version = 11 : i64} {
  func.func @_attn_kernel(%arg0: i32, %arg1: memref<1x1x32xf32, #tpu.memory_space<vmem>>, %arg2: memref<1x8x32xf32, #tpu.memory_space<vmem>>, %arg3: memref<1x1x8xf32, #tpu.memory_space<vmem>>) attributes {dimension_semantics = [#tpu.dimension_semantics<parallel>], iteration_bounds = array<i64: 2>, scalar_prefetch = 0 : i64, scratch_operands = 0 : i64, tpu.core_type = #tpu.core_type<tc>, window_params = [{transform_indices = @transform_0, window_bounds = array<i64: 1, 1, 32>}, {transform_indices = @transform_1, window_bounds = array<i64: 1, 8, 32>}, {transform_indices = @transform_2, window_bounds = array<i64: 1, 1, 8>}]} {
    %c0 = arith.constant 0 : index
    %c0_0 = arith.constant 0 : index
    %c0_1 = arith.constant 0 : index
    %0 = vector.load %arg1[%c0, %c0_0, %c0_1] : memref<1x1x32xf32, #tpu.memory_space<vmem>>, vector<1x1x32xf32>
    %cst = arith.constant 3.125000e-02 : f32
    %1 = vector.broadcast %cst : f32 to vector<1x1x32xf32>
    %2 = arith.mulf %0, %1 : vector<1x1x32xf32>
    %c0_2 = arith.constant 0 : index
    %c0_3 = arith.constant 0 : index
    %c0_4 = arith.constant 0 : index
    %3 = vector.load %arg2[%c0_2, %c0_3, %c0_4] : memref<1x8x32xf32, #tpu.memory_space<vmem>>, vector<1x8x32xf32>
    "tpu.trace_start"() <{level = 10 : i32, message = "bqh,bsh->bqs"}> : () -> ()
    %cst_5 = arith.constant dense<0.000000e+00> : vector<1x1x8xf32>
    %4 = tpu.matmul %2, %3, %cst_5 {dimension_numbers = #tpu.dot_dimension_numbers<[2], [2], [1], [1], [0, 0, 0, 1, 1, 1], [0], [0]>} : vector<1x1x32xf32>, vector<1x8x32xf32>, vector<1x1x8xf32> -> vector<1x1x8xf32>
    "tpu.trace_stop"() : () -> ()
    %cst_6 = arith.constant dense<0xFF800000> : vector<1x1xf32>
    %5 = vector.multi_reduction <maximumf>, %4, %cst_6 [2] : vector<1x1x8xf32> to vector<1x1xf32>
    %6 = vector.shape_cast %5 : vector<1x1xf32> to vector<1x1x1xf32>
    %7 = vector.broadcast %6 : vector<1x1x1xf32> to vector<1x1x8xf32>
    %8 = arith.subf %4, %7 : vector<1x1x8xf32>
    %9 = math.exp %8 : vector<1x1x8xf32>
    %cst_7 = arith.constant dense<0.000000e+00> : vector<1x1xf32>
    %10 = vector.multi_reduction <add>, %9, %cst_7 [2] : vector<1x1x8xf32> to vector<1x1xf32>
    %11 = vector.shape_cast %10 : vector<1x1xf32> to vector<1x1x1xf32>
    %12 = tpu.reciprocal %11 {approx = true} : vector<1x1x1xf32> -> vector<1x1x1xf32>
    %13 = vector.broadcast %12 : vector<1x1x1xf32> to vector<1x1x8xf32>
    %14 = arith.mulf %9, %13 : vector<1x1x8xf32>
    %c0_8 = arith.constant 0 : index
    %c0_9 = arith.constant 0 : index
    %c0_10 = arith.constant 0 : index
    %15 = vector.load %arg3[%c0_8, %c0_9, %c0_10] : memref<1x1x8xf32, #tpu.memory_space<vmem>>, vector<1x1x8xf32>
    tpu.vector_store %arg3[%c0_8, %c0_9, %c0_10], %14 {strides = array<i32>} : memref<1x1x8xf32, #tpu.memory_space<vmem>>, vector<1x1x8xf32>,
    return
  }
  func.func @transform_0(%arg0: i32) -> (i32, i32, i32) {
    %c0_i32 = arith.constant 0 : i32
    %c0_i32_0 = arith.constant 0 : i32
    %c0_i32_1 = arith.constant 0 : i32
    return %arg0, %c0_i32, %c0_i32_0 : i32, i32, i32
  }
  func.func @transform_1(%arg0: i32) -> (i32, i32, i32) {
    %c0_i32 = arith.constant 0 : i32
    %c0_i32_0 = arith.constant 0 : i32
    %c0_i32_1 = arith.constant 0 : i32
    return %arg0, %c0_i32, %c0_i32_0 : i32, i32, i32
  }
  func.func @transform_2(%arg0: i32) -> (i32, i32, i32) {
    %c0_i32 = arith.constant 0 : i32
    %c0_i32_0 = arith.constant 0 : i32
    %c0_i32_1 = arith.constant 0 : i32
    return %arg0, %c0_i32, %c0_i32_0 : i32, i32, i32
  }
}

</mosaic_0001>

<bundles_post_ra>
// kernel: tpu_custom_call.1
= control target key start
LH: loop header
LB: loop body
LE: loop exit
PB: predicated region body
PF: predicated region fallthrough
CT: control target
= control target key end

     0   :  { %7 = vsyncpa [#allocation3], 0  ;;  %s716_s0 = inlined_call_operand.hbm [shape: f32[2,1,32], index: 0, kind: input, shape index: {}]   ;;  %s717_s1 = inlined_call_operand.hbm [shape: f32[2,8,32], index: 1, kind: input, shape index: {}]   ;;  %s718_s2 = inlined_call_operand.hbm [shape: f32[2,1,8], index: 2, kind: output, shape index: {}]  }
   0x1   :  { %9 = vsyncpa [#allocation3 + $0x1], 0 }
   0x2   :  { %10 = vsyncpa [#allocation6], 0 }
   0x3   :  { %12 = vsyncpa [#allocation6 + $0x1], 0 }
   0x4   :  { %13 = vsyncpa [#allocation4], 0 }
   0x5   :  { %15 = vsyncpa [#allocation4 + $0x1], 0  ;;  %s549_s9 = smov 0   ;;  %s551_s10 = smov 0  }
   0x6   :  { %s553_s11 = smov 0   ;;  %s555_s12 = smov 0  }
   0x7 LB: > { %s570_s13 = sadd.s32 4294967295, %s532_s12   ;;  %s336_s14 = sadd.s32 4294967294, %s532_s12   ;;  %s532_s12 = sphi %s555_s12, %s729_s12   ;;  %s528_s11 = sphi %s553_s11, %s728_s11   ;;  %s524_s10 = sphi %s551_s10, %s727_s10   ;;  %s520_s9 = sphi %s549_s9, %s726_s9  }
   0x8   : > { %s574_s15 = sadd.s32 1, %s532_s12   ;;  %s28_s16 = sadd.s32 1, %s528_s11 }
   0x9   : > { %s25_s17 = ssub.s32 %s532_s12, %s574_s15  ;;  %p35_p0 = scmp.ne.s32.totalorder %s528_s11, %s524_s10 }
   0xa   : > { %p26_p1 = scmp.eq.s32.totalorder %s25_s17, 0  ;;  %p36_p2 = scmp.eq.s32.totalorder %s532_s12, 0 }
   0xb   : > { %p41_p3 = scmp.ne.s32.totalorder %s524_s10, %s520_s9  ;;  %p42_p4 = scmp.eq.s32.totalorder %s570_s13, 0 }
   0xc   : > { %s586_s18 = scalar_select %p26_p1, %s528_s11, %s28_s16  }
   0xd   : > { %p588_p5 = por %p36_p2, %p35_p0  ;;  %p592_p6 = por %p42_p4, %p41_p3 }
   0xe   : > { %p91_p7 = scmp.eq.s32.totalorder %s570_s13, 1  ;;  %p97_p8 = scmp.eq.s32.totalorder %s336_s14, 1 }
   0xf   : > { %p364_p10 = scmp.lt.s32.totalorder %s532_s12, 2  ;;  %s608_s23 = sand.u32 1, %s528_s11  }
  0x10   : > { %p599_p11 = por %p91_p7, %p35_p0  ;;  %p603_p12 = por %p97_p8, %p41_p3 }
  0x11   : > { %s123_s26 = scalar_lea.hbm %s716_s0, %s532_s12  ;;  %s120_s28 = scalar_lea.vmem [#allocation2], %s608_s23 }
  0x12   : > { %s125_s27 = sshll.u32 %s123_s26, 4  ;;  %s127_s29 = sshll.u32 %s120_s28, 4  ;;  %s126_s27 = int_to_ptr.hbm [resolvable:$true] %s125_s27  ;;  %s128_s29 = int_to_ptr.vmem [resolvable:$true] %s127_s29 }
  0x13   : > { %p617_p13 = pnand %p364_p10, %p588_p5  ;;  %p341_p0 = scmp.ge.s32.totalorder %s532_s12, 1 }
  0x14   : > { %p151_p1 = scmp.lt.s32.totalorder %s532_s12, 3  ;;  %s339_s3 = sshll.u32 %s608_s23, 3 }
  0x15   : > { %s118_s4 = scalar_lea.sflag [#allocation3], %s608_s23  ;;  %s402_s5 = sshra.s32 %s126_s27, 4  ;;  %s403_s5 = int_to_ptr.hbm [resolvable:$true] %s402_s5 }
  0x16   : > { %s404_s6 = scalar_lea.hbm %s403_s5, 1  ;;  %p406_p3 = pneg %p617_p13 }
  0x17   : > { %p405_p2 = scmp.ne.s32.totalorder %s403_s5, %s404_s6  ;;  %s409_s14 = scalar_lea.hbm %s716_s0, 2 }
  0x18   : > { %p410_p5 = scmp.lt.s32.totalorder %s403_s5, %s716_s0  ;;  %p411_p8 = scmp.lt.s32.totalorder %s409_s14, %s404_s6 }
  0x19   : > { %p407_p4 = pnand %p406_p3, %p405_p2 }
  0x1a   : > { %p412_p10 = por %p411_p8, %p410_p5 }
  0x1b   : > { %p408_p7 = pneg %p407_p4 }
  0x1d   : > { %p413_p9 = pnand %p412_p10, %p408_p7 }
  0x1f   : > { %416 = shalt.err (!%p413_p9)
}
  0x20   : > { %356 = dma.hbm_to_vmem [thread:$0]  (!%p617_p13), %s126_s27, 16, %s128_s29, %s118_s4  }
  0x21   : > { %p642_p2 = pnand %p341_p0, %p151_p1  ;;  %s340_s24 = sshll.u32 %s532_s12, 3 }
  0x22   : > { %s138_s25 = scalar_lea.vmem [#allocation5], %s339_s3  ;;  %s142_s6 = scalar_lea.hbm %s717_s1, %s340_s24 }
  0x23   : > { %s146_s26 = sshll.u32 %s138_s25, 4  ;;  %s144_s7 = sshll.u32 %s142_s6, 4  ;;  %s147_s26 = int_to_ptr.vmem [resolvable:$true] %s146_s26  ;;  %s145_s7 = int_to_ptr.hbm [resolvable:$true] %s144_s7 }
  0x24   : > { %s135_s8 = scalar_lea.sflag [#allocation6], %s608_s23  ;;  %s432_s14 = sshra.s32 %s145_s7, 4  ;;  %s433_s14 = int_to_ptr.hbm [resolvable:$true] %s432_s14 }
  0x25   : > { %s434_s27 = scalar_lea.hbm %s433_s14, 8  ;;  %s439_s3 = scalar_lea.hbm %s717_s1, 16 }
  0x26   : > { %p435_p9 = scmp.ne.s32.totalorder %s433_s14, %s434_s27  ;;  %p440_p4 = scmp.lt.s32.totalorder %s433_s14, %s717_s1 }
  0x27   : > { %p441_p7 = scmp.lt.s32.totalorder %s439_s3, %s434_s27 }
  0x28   : > { %p437_p0 = pnand %p435_p9, %p406_p3 }
  0x29   : > { %p442_p5 = por %p441_p7, %p440_p4 }
  0x2a   : > { %p438_p1 = pneg %p437_p0 }
  0x2c   : > { %p443_p8 = pnand %p442_p5, %p438_p1 }
  0x2e   : > { %446 = shalt.err (!%p443_p8)
}
  0x2f   : > { %359 = dma.hbm_to_vmem [thread:$0]  (!%p617_p13), %s145_s7, 128, %s147_s26, %s135_s8  }
  0x30   : > { %155 = sbr.rel (%p642_p2) target bundleno = 444 (0x1bc), region = 28  ;;  %s665_s23 = sand.u32 (!%p642_p2), 1, %s524_s10  }
  0x31   : > { %s158_s24 = scalar_lea.sflag (!%p642_p2), [#allocation3], %s665_s23  ;;  %s160_s25 = scalar_lea.vmem (!%p642_p2), [#allocation2], %s665_s23 }
  0x35   : > { %507 = dma.done.wait (%p592_p6), %s158_s24, 16  }
  0x36   : > { %509 = vsyncadd (%p592_p6), %s158_s24, 4294967280  ;;  %s342_s30 = sshll.u32 %s665_s23, 3  ;;  %s167_s26 = scalar_lea.sflag [#allocation6], %s665_s23 }
  0x37   : > { %s170_s19 = scalar_lea.vmem [#allocation5], %s342_s30 }
  0x38   : > { %511 = dma.done.wait (%p592_p6), %s167_s26, 128  }
  0x39   : > { %513 = vsyncadd (%p592_p6), %s167_s26, 4294967168  ;;  %vm198_vm0 = vcmask 261120   ;;  %v197_v0 = vld [vmem:[%s170_s19] sm:$0xff]  ;;  %v195_v1 = vld [vmem:[%s160_s25] sm:$0x1]  ;;  %vm225_vm1 = vcmask 57344   ;;  %s247_s5 = scalar_lea.hbm %s718_s2, %s570_s13 }
  0x3a   : > { %343 = vmatpush.xpose.msk.msra.mxu0 %vm198_vm0, %v197_v0  ;;  %v196_v2 = vmul.f32 0.03125, %v195_v1  ;;  %s194_s6 = scalar_lea.vmem [#allocation7], %s665_s23  ;;  %s251_s8 = sshll.u32 %s247_s5, 4  ;;  %s252_s8 = int_to_ptr.hbm [resolvable:$true] %s251_s8 }
  0x3b   : > { %s249_s7 = sshll.u32 %s194_s6, 4  ;;  %s239_s14 = scalar_lea.sflag [#allocation4], %s665_s23  ;;  %s250_s7 = int_to_ptr.vmem [resolvable:$true] %s249_s7 }
  0x3c   : > { %s476_s27 = sshra.s32 %s252_s8, 4  ;;  %s482_s13 = scalar_lea.hbm %s718_s2, 2  ;;  %s477_s27 = int_to_ptr.hbm [resolvable:$true] %s476_s27 }
  0x3d   : > { %344 = vmatmul.msk.f32.vlgmr.msra.gmra.mxu0 %vm198_vm0, %v196_v2  ;;  %s478_s29 = scalar_lea.hbm %s477_s27, 1  ;;  %p483_p10 = scmp.lt.s32.totalorder %s477_s27, %s718_s2 }
  0x3e   : > { %p479_p6 = scmp.ne.s32.totalorder %s477_s27, %s478_s29  ;;  %p484_p2 = scmp.lt.s32.totalorder %s482_s13, %s478_s29 }
  0x40   : > { %p480_p13 = pnand %p479_p6, %p599_p11  ;;  %p485_p9 = por %p484_p2, %p483_p10 }
  0x42   : > { %p481_p3 = pneg %p480_p13 }
  0x44   : > { %p486_p0 = pnand %p485_p9, %p481_p3 }
  0xba   : > { %v222_v3 = vpop.f32.mrf.mxu0 }
  0xbb   : > { %v226_v4 = vsel %vm225_vm1, %v222_v3, -inf }
  0xbc   : > { %227 = vmax.xlane.f32.xlu0 %v226_v4 }
 0x12f   : > { %v228_v5 = vpop.xlane.xlu0 %227 }
 0x130   : > { %v229_v6 = vsub.f32 %v222_v3, %v228_v5 }
 0x132   : > { %v230_v7 = vmul.f32 1.442695, %v229_v6 }
 0x134   : > { %398 = vpow2.f32 %v230_v7 }
 0x13a   : > { %v399_v8 = vpop.eup %398 }
 0x13b   : > { %v232_v9 = vsel %vm225_vm1, %v399_v8, 0.0 }
 0x13c   : > { %233 = vadd.xlane.f32.xlu0 %v232_v9 }
 0x1af   : > { %v234_v10 = vpop.xlane.xlu0 %233 }
 0x1b0   : > { %400 = vrcp.f32 %v234_v10 }
 0x1b6   : > { %v401_v11 = vpop.eup %400 }
 0x1b7   : > { %v236_v12 = vmul.f32 %v401_v11, %v399_v8 }
 0x1b9   : > { %237 = vst.msk [vmem:[%s194_s6] sm:$0x1] %vm225_vm1, %v236_v12 }
 0x1ba   : > { %489 = shalt.err (!%p486_p0)
}
 0x1bb   : > { %351 = dma.vmem_to_hbm [thread:$0]  (%p599_p11), %s250_s7, 16, %s252_s8, %s239_s14  }
 0x1bc PF: > { %s263_s23 = sand.u32 1, %s520_s9   ;;  %p725_p1 = scmp.ge.s32.totalorder %s532_s12, 2 }
 0x1bd   : > { %s264_s24 = scalar_lea.sflag [#allocation4], %s263_s23 }
 0x1be   : > { %p361_p4 = pnand %p725_p1, %p603_p12 }
 0x1c0   : > { %p362_p7 = pneg %p361_p4 }
 0x1c2   : > { %515 = dma.done.wait (%p362_p7), %s264_s24, 16  }
 0x1c3   : > { %517 = vsyncadd (%p362_p7), %s264_s24, 4294967280  ;;  %p18_p5 = scmp.ge.s32.totalorder %s574_s15, 4   ;;  %s726_s9 = smov %s524_s10 }
 0x1c4   : > { %s727_s10 = smov %s528_s11  ;;  %s728_s11 = smov %s586_s18 }
 0x1c5   : > { %s729_s12 = smov %s574_s15  ;;  %20 = sbr.rel (!%p18_p5) target bundleno = 7 (0x7), region = 86 }
 0x1ca   :  { %269 = vsyncpa [#allocation3], 1 }
 0x1cb   :  { %271 = vsyncpa [#allocation3 + $0x1], 1 }
 0x1cc   :  { %272 = vsyncpa [#allocation6], 1 }
 0x1cd   :  { %274 = vsyncpa [#allocation6 + $0x1], 1 }
 0x1ce   :  { %275 = vsyncpa [#allocation4], 1 }
 0x1cf   :  { %277 = vsyncpa [#allocation4 + $0x1], 1 }

</bundles_post_ra>
